<compile_context>
chip_gen: v6e
topology: v6e:2x2x1
jax: 0.10.0
libtpu: 0.0.40
codegen_flags: <defaults>
</compile_context>

<pallas_src>
import jax
import jax.numpy as jnp
from jax.experimental import pallas as pl
from jax.experimental.pallas import tpu as pltpu

NUM_INPUTS = 22     # Walker2DPyBulletEnv-v0 observation dim
NUM_OUTPUTS = 6     # Walker2DPyBulletEnv-v0 action dim
HIDDEN = 64
OUT_LANES = 128     # lane-dense output slab width (value | mu | zero padding)
DEFAULT_TILE = 256  # batch rows per grid step (v6e/v7x); pass 128 for v5e


def actor_critic_kernel(x_ref, w1_ref, w2_ref, b2_ref, out_ref):
    """Fused 2-layer actor+critic MLP, one batch tile per grid step.

    x_ref  : (TB, 24)   observation, ones column at col NUM_INPUTS, zero-padded
    w1_ref : (24, 128)  [w1_critic | w1_actor] packed; row NUM_INPUTS = layer-1 bias
    w2_ref : (128, 128) block-diagonal: [:64, 0]=w2c, [64:, 1:7]=w2a, rest 0
    b2_ref : (1, 128)   packed layer-2 bias (f32)
    out_ref: (TB, 128)  col 0 = value, cols 1..6 = tanh(mu_pre), rest = 0
    """
    # Layer 1 (critic+actor fused, bias folded into the matmul): one MXU pass.
    h = jnp.maximum(
        jnp.dot(x_ref[...], w1_ref[...], preferred_element_type=jnp.float32),
        0.0,
    )
    # Keep the MXU operand dtype of the packed weights (bf16 on v6e/v7x path);
    # accumulation and the elementwise tail stay f32.
    h = h.astype(w2_ref.dtype)

    # Layer 2 (block-diagonal fusion): one MXU pass with K=128, N=128.
    y = jnp.dot(h, w2_ref[...], preferred_element_type=jnp.float32) + b2_ref[...]

    # tanh applies to the actor columns only; column 0 is the raw critic value.
    col = jax.lax.broadcasted_iota(jnp.int32, y.shape, dimension=1)
    out_ref[...] = jnp.where(col == 0, y, jnp.tanh(y))


def actor_critic_forward(x, packed, tile=DEFAULT_TILE):
    """Runs the fused kernel; returns (mu, std, value) like the torch module."""
    w1, w2, b2, std = packed
    B, D = x.shape
    A = std.shape[1]
    K1 = w1.shape[0]          # augmented/padded input dim (24)
    KH = w2.shape[0]          # 2*hidden (128)

    # Augment x with a ones column (bias fold) and zero-pad to K1 columns.
    ones = jnp.ones((B, 1), x.dtype)
    pad = jnp.zeros((B, K1 - D - 1), x.dtype)
    x_aug = jnp.concatenate([x, ones, pad], axis=1).astype(w1.dtype)

    TB = B if B <= tile else tile
    grid = (pl.cdiv(B, TB),)
    const = lambda i: (0, 0)   # weights resident in VMEM across all batch tiles

    slab = pl.pallas_call(
        actor_critic_kernel,
        out_shape=jax.ShapeDtypeStruct((B, OUT_LANES), jnp.float32),
        grid=grid,
        in_specs=[
            pl.BlockSpec((TB, K1), lambda i: (i, 0)),
            pl.BlockSpec((K1, OUT_LANES), const),
            pl.BlockSpec((KH, OUT_LANES), const),
            pl.BlockSpec((1, OUT_LANES), const),
        ],
        out_specs=pl.BlockSpec((TB, OUT_LANES), lambda i: (i, 0)),
        compiler_params=pltpu.CompilerParams(
            dimension_semantics=("parallel",)),
    )(x_aug, w1, w2, b2)

    value = slab[:, 0:1]
    mu = slab[:, 1:1 + A]
    std_b = jnp.broadcast_to(std.astype(jnp.float32), (B, A))  # x-independent
    return mu, std_b, value


def init_params(key, num_inputs=NUM_INPUTS, num_outputs=NUM_OUTPUTS,
                hidden=HIDDEN, std=0.0):
    """Matches torch init_weights: Linear W ~ N(0, 0.1), b = 0, log_std = std."""
    ks = jax.random.split(key, 4)
    w1c = 0.1 * jax.random.normal(ks[0], (num_inputs, hidden), jnp.float32)
    b1c = jnp.zeros((1, hidden), jnp.float32)
    w2c = 0.1 * jax.random.normal(ks[1], (hidden, 1), jnp.float32)
    b2c = jnp.zeros((1, 1), jnp.float32)
    w1a = 0.1 * jax.random.normal(ks[2], (num_inputs, hidden), jnp.float32)
    b1a = jnp.zeros((1, hidden), jnp.float32)
    w2a = 0.1 * jax.random.normal(ks[3], (hidden, num_outputs), jnp.float32)
    b2a = jnp.zeros((1, num_outputs), jnp.float32)
    log_std = jnp.full((1, num_outputs), std, jnp.float32)
    return (w1c, b1c, w2c, b2c, w1a, b1a, w2a, b2a, log_std)


def pack_params(params, dtype=jnp.float32):
    """One-time packing (per parameter update) into 3 weight operands + std.

    dtype=jnp.bfloat16 gives MXU-native operands on v6e/v7x; the layer-2 bias
    and all elementwise math stay f32.
    """
    (w1c, b1c, w2c, b2c, w1a, b1a, w2a, b2a, log_std) = params
    num_inputs, hidden = w1c.shape
    A = w2a.shape[1]
    K1 = 8 * ((num_inputs + 1 + 7) // 8)   # ones column + pad to multiple of 8

    # Layer 1: concat critic|actor along output features; bias as extra row.
    w1 = jnp.zeros((K1, 2 * hidden), jnp.float32)
    w1 = w1.at[:num_inputs, :hidden].set(w1c)
    w1 = w1.at[:num_inputs, hidden:].set(w1a)
    w1 = w1.at[num_inputs, :hidden].set(b1c[0])
    w1 = w1.at[num_inputs, hidden:].set(b1a[0])

    # Layer 2: block-diagonal, padded to OUT_LANES output columns.
    w2 = jnp.zeros((2 * hidden, OUT_LANES), jnp.float32)
    w2 = w2.at[:hidden, 0:1].set(w2c)                  # critic -> col 0
    w2 = w2.at[hidden:, 1:1 + A].set(w2a)              # actor  -> cols 1..A

    b2 = jnp.zeros((1, OUT_LANES), jnp.float32)
    b2 = b2.at[:, 0:1].set(b2c)
    b2 = b2.at[:, 1:1 + A].set(b2a)

    std = jnp.exp(log_std)                             # [1, A], hoisted
    return (w1.astype(dtype), w2.astype(dtype), b2, std)


def reference_forward(x, params):
    (w1c, b1c, w2c, b2c, w1a, b1a, w2a, b2a, log_std) = params
    h_c = jnp.maximum(x @ w1c + b1c, 0.0)
    value = h_c @ w2c + b2c
    h_a = jnp.maximum(x @ w1a + b1a, 0.0)
    mu = jnp.tanh(h_a @ w2a + b2a)
    std = jnp.broadcast_to(jnp.exp(log_std), mu.shape)
    return mu, std, value


if __name__ == "__main__":
    key = jax.random.PRNGKey(0)
    k_x, k_p = jax.random.split(key)
    B = 64
    x = jax.random.normal(k_x, (B, NUM_INPUTS), jnp.float32)
    params = init_params(k_p)
    mu_r, std_r, value_r = reference_forward(x, params)

    fwd = jax.jit(actor_critic_forward, static_argnames=("tile",))

    # f32 path, single batch tile.
    packed_f32 = pack_params(params, jnp.float32)
    mu, std, value = fwd(x, packed_f32)
    jax.block_until_ready((mu, std, value))
    assert mu.shape == (B, NUM_OUTPUTS) and std.shape == (B, NUM_OUTPUTS)
    assert value.shape == (B, 1)
    assert jnp.allclose(mu, mu_r, atol=1e-5)
    assert jnp.allclose(std, std_r, atol=1e-5)
    assert jnp.allclose(value, value_r, atol=1e-5)

    # f32 path, multi-tile batch grid (exercise the "parallel" grid axis).
    mu2, std2, value2 = fwd(x, packed_f32, tile=16)
    jax.block_until_ready((mu2, std2, value2))
    assert jnp.allclose(mu2, mu_r, atol=1e-5)
    assert jnp.allclose(value2, value_r, atol=1e-5)

    # bf16 operand path (v6e/v7x MXU-native), looser tolerance vs. f32 reference.
    packed_bf16 = pack_params(params, jnp.bfloat16)
    mu3, std3, value3 = fwd(x, packed_bf16, tile=16)
    jax.block_until_ready((mu3, std3, value3))
    assert jnp.allclose(mu3, mu_r, atol=2e-2)
    assert jnp.allclose(std3, std_r, atol=1e-5)
    assert jnp.allclose(value3, value_r, atol=2e-2)

    print("KERNEL_OK")
</pallas_src>

<mosaic_0001>
module attributes {stable_mosaic.version = 11 : i64} {
  func.func @actor_critic_kernel(%arg0: i32, %arg1: memref<64x24xf32, #tpu.memory_space<vmem>>, %arg2: memref<24x128xf32, #tpu.memory_space<vmem>>, %arg3: memref<128x128xf32, #tpu.memory_space<vmem>>, %arg4: memref<1x128xf32, #tpu.memory_space<vmem>>, %arg5: memref<64x128xf32, #tpu.memory_space<vmem>>) attributes {dimension_semantics = [#tpu.dimension_semantics<parallel>], iteration_bounds = array<i64: 1>, scalar_prefetch = 0 : i64, scratch_operands = 0 : i64, tpu.core_type = #tpu.core_type<tc>, window_params = [{transform_indices = @transform_0, window_bounds = array<i64: 64, 24>}, {pipeline_mode = #tpu.pipeline_mode<synchronous>, transform_indices = @transform_1, window_bounds = array<i64: 24, 128>}, {pipeline_mode = #tpu.pipeline_mode<synchronous>, transform_indices = @transform_2, window_bounds = array<i64: 128, 128>}, {pipeline_mode = #tpu.pipeline_mode<synchronous>, transform_indices = @transform_3, window_bounds = array<i64: 1, 128>}, {transform_indices = @transform_4, window_bounds = array<i64: 64, 128>}]} {
    %c0 = arith.constant 0 : index
    %c0_0 = arith.constant 0 : index
    %0 = vector.load %arg1[%c0, %c0_0] : memref<64x24xf32, #tpu.memory_space<vmem>>, vector<64x24xf32>
    %c0_1 = arith.constant 0 : index
    %c0_2 = arith.constant 0 : index
    %1 = vector.load %arg2[%c0_1, %c0_2] : memref<24x128xf32, #tpu.memory_space<vmem>>, vector<24x128xf32>
    %cst = arith.constant dense<0.000000e+00> : vector<64x128xf32>
    %2 = tpu.matmul %0, %1, %cst {dimension_numbers = #tpu.dot_dimension_numbers<[1], [0], [0], [1], [0, 0, 1, 1], [], []>} : vector<64x24xf32>, vector<24x128xf32>, vector<64x128xf32> -> vector<64x128xf32>
    %cst_3 = arith.constant 0.000000e+00 : f32
    %3 = vector.broadcast %cst_3 : f32 to vector<64x128xf32>
    %4 = arith.maximumf %2, %3 : vector<64x128xf32>
    %c0_4 = arith.constant 0 : index
    %c0_5 = arith.constant 0 : index
    %5 = vector.load %arg3[%c0_4, %c0_5] : memref<128x128xf32, #tpu.memory_space<vmem>>, vector<128x128xf32>
    %cst_6 = arith.constant dense<0.000000e+00> : vector<64x128xf32>
    %6 = tpu.matmul %4, %5, %cst_6 {dimension_numbers = #tpu.dot_dimension_numbers<[1], [0], [0], [1], [0, 0, 1, 1], [], []>} : vector<64x128xf32>, vector<128x128xf32>, vector<64x128xf32> -> vector<64x128xf32>
    %c0_7 = arith.constant 0 : index
    %c0_8 = arith.constant 0 : index
    %7 = vector.load %arg4[%c0_7, %c0_8] : memref<1x128xf32, #tpu.memory_space<vmem>>, vector<1x128xf32>
    %8 = vector.broadcast %7 : vector<1x128xf32> to vector<64x128xf32>
    %9 = arith.addf %6, %8 : vector<64x128xf32>
    %10 = tpu.iota {dimensions = array<i32: 1>} : vector<64x128xi32>
    %c0_i32 = arith.constant 0 : i32
    %11 = vector.broadcast %c0_i32 : i32 to vector<64x128xi32>
    %12 = arith.cmpi eq, %10, %11 : vector<64x128xi32>
    %13 = math.tanh %9 : vector<64x128xf32>
    %14 = arith.select %12, %9, %13 : vector<64x128xi1>, vector<64x128xf32>
    %c0_9 = arith.constant 0 : index
    %c0_10 = arith.constant 0 : index
    %15 = vector.load %arg5[%c0_9, %c0_10] : memref<64x128xf32, #tpu.memory_space<vmem>>, vector<64x128xf32>
    tpu.vector_store %arg5[%c0_9, %c0_10], %14 {strides = array<i32>} : memref<64x128xf32, #tpu.memory_space<vmem>>, vector<64x128xf32>,
    return
  }
  func.func @transform_0(%arg0: i32) -> (i32, i32) {
    %c0_i32 = arith.constant 0 : i32
    %c0_i32_0 = arith.constant 0 : i32
    return %arg0, %c0_i32 : i32, i32
  }
  func.func @transform_1(%arg0: i32) -> (i32, i32) {
    %c0_i32 = arith.constant 0 : i32
    %c0_i32_0 = arith.constant 0 : i32
    %c0_i32_1 = arith.constant 0 : i32
    return %c0_i32, %c0_i32_0 : i32, i32
  }
  func.func @transform_2(%arg0: i32) -> (i32, i32) {
    %c0_i32 = arith.constant 0 : i32
    %c0_i32_0 = arith.constant 0 : i32
    %c0_i32_1 = arith.constant 0 : i32
    return %c0_i32, %c0_i32_0 : i32, i32
  }
  func.func @transform_3(%arg0: i32) -> (i32, i32) {
    %c0_i32 = arith.constant 0 : i32
    %c0_i32_0 = arith.constant 0 : i32
    %c0_i32_1 = arith.constant 0 : i32
    return %c0_i32, %c0_i32_0 : i32, i32
  }
  func.func @transform_4(%arg0: i32) -> (i32, i32) {
    %c0_i32 = arith.constant 0 : i32
    %c0_i32_0 = arith.constant 0 : i32
    return %arg0, %c0_i32 : i32, i32
  }
}

</mosaic_0001>

<bundles_post_ra>
// kernel: actor_critic_forward.1
= control target key start
LH: loop header
LB: loop body
LE: loop exit
PB: predicated region body
PF: predicated region fallthrough
CT: control target
= control target key end

     0   :  { %vm28_vm0 = vcmask 195584   ;;  %v294_v50 = vlaneseq  ;;  %s628_s1 = inlined_call_operand.vmem [shape: f32[24,128], index: 1, kind: input, shape index: {}]   ;;  %s629_s0 = inlined_call_operand.vmem [shape: f32[64,24], index: 0, kind: input, shape index: {}]   ;;  %s630_s2 = inlined_call_operand.vmem [shape: f32[128,128], index: 2, kind: input, shape index: {}]   ;;  %s631_s3 = inlined_call_operand.vmem [shape: f32[1,128], index: 3, kind: input, shape index: {}]   ;;  %s632_s4 = inlined_call_operand.vmem [shape: f32[64,128], index: 4, kind: output, shape index: {}]  }
   0x1   :  { %v27_v0 = vld [vmem:[%s628_s1 + $0x10] sm:$0xff]  ;;  %v26_v1 = vld [vmem:[%s628_s1 + $0x8] sm:$0xff]  ;;  %v17_v2 = vld [vmem:[%s629_s0] sm:$0xff] }
   0x2   :  { %369 = vmatprep.subr.mxu0 %v27_v0  ;;  %v25_v3 = vld [vmem:[%s628_s1] sm:$0xff]  ;;  %375 = vmatprep.mubr.msk.f32.mxu0 %vm28_vm0, %v17_v2  ;;  %v181_v4 = vld [vmem:[%s630_s2 + $0x78] sm:$0xff]  ;;  %v18_v5 = vld [vmem:[%s629_s0 + $0x8] sm:$0xff]  ;;  %v295_v55 = vand.u32 127, %v294_v50 }
   0x3   :  { %370 = vmatpush3.msra.mxu0 %v27_v0  ;;  %431 = vmatprep.subr.mxu1 %v181_v4  ;;  %v19_v6 = vld [vmem:[%s629_s0 + $0x10] sm:$0xff]  ;;  %v20_v8 = vld [vmem:[%s629_s0 + $0x18] sm:$0xff]  ;;  %v179_v9 = vld [vmem:[%s630_s2 + $0x68] sm:$0xff] }
   0x4   :  { %371 = vmatprep.subr.mxu0 %v26_v1  ;;  %v180_v7 = vld [vmem:[%s630_s2 + $0x70] sm:$0xff]  ;;  %447 = vmatpush3.msra.mxu1 %v181_v4  ;;  %v21_v10 = vld [vmem:[%s629_s0 + $0x20] sm:$0xff]  ;;  %v22_v12 = vld [vmem:[%s629_s0 + $0x28] sm:$0xff]  ;;  %vm296_vm1 = vcmp.eq.s32.totalorder %v295_v55, 0 }
   0x5   :  { %372 = vmatpush3.msra.mxu0 %v26_v1  ;;  %432 = vmatprep.subr.mxu1 %v180_v7  ;;  %v178_v11 = vld [vmem:[%s630_s2 + $0x60] sm:$0xff]  ;;  %v177_v13 = vld [vmem:[%s630_s2 + $0x58] sm:$0xff]  ;;  %v23_v14 = vld [vmem:[%s629_s0 + $0x30] sm:$0xff] }
   0x6   :  { %373 = vmatprep.subr.mxu0 %v25_v3  ;;  %448 = vmatpush3.msra.mxu1 %v180_v7  ;;  %v176_v15 = vld [vmem:[%s630_s2 + $0x50] sm:$0xff]  ;;  %v24_v16 = vld [vmem:[%s629_s0 + $0x38] sm:$0xff]  ;;  %v175_v17 = vld [vmem:[%s630_s2 + $0x48] sm:$0xff] }
   0x7   :  { %374 = vmatpush3.msra.mxu0 %v25_v3  ;;  %433 = vmatprep.subr.mxu1 %v179_v9  ;;  %v174_v18 = vld [vmem:[%s630_s2 + $0x40] sm:$0xff]  ;;  %v173_v19 = vld [vmem:[%s630_s2 + $0x38] sm:$0xff]  ;;  %v172_v20 = vld [vmem:[%s630_s2 + $0x30] sm:$0xff] }
   0x8   :  { %376 = vmatmul.mubr.msk.f32.vlgmr.msra.gmra.mxu0 %vm28_vm0, %v18_v5  ;;  %387 = vmatprep.subr.mxu0 %v181_v4  ;;  %v171_v21 = vld [vmem:[%s630_s2 + $0x28] sm:$0xff]  ;;  %v170_v22 = vld [vmem:[%s630_s2 + $0x20] sm:$0xff]  ;;  %v169_v23 = vld [vmem:[%s630_s2 + $0x18] sm:$0xff] }
   0x9   :  { %378 = vmatprep.mubr.msk.f32.mxu0 %vm28_vm0, %v19_v6  ;;  %388 = vmatpush3.msra.mxu0 %v181_v4  ;;  %v168_v24 = vld [vmem:[%s630_s2 + $0x10] sm:$0xff]  ;;  %v167_v25 = vld [vmem:[%s630_s2 + $0x8] sm:$0xff]  ;;  %v166_v26 = vld [vmem:[%s630_s2] sm:$0xff] }
   0xa   :  { %389 = vmatprep.subr.mxu0 %v180_v7  ;;  %449 = vmatpush3.msra.mxu1 %v179_v9  ;;  %v333_v43 = vld [vmem:[%s631_s3] ss:$0 sm:$0xff] }
   0xb   :  { %390 = vmatpush3.msra.mxu0 %v180_v7  ;;  %434 = vmatprep.subr.mxu1 %v178_v11 }
   0xc   :  { %379 = vmatmul.mubr.msk.f32.gmra.mxu0 %vm28_vm0, %v20_v8  ;;  %391 = vmatprep.subr.mxu0 %v179_v9 }
   0xd   :  { %381 = vmatprep.mubr.msk.f32.mxu0 %vm28_vm0, %v21_v10  ;;  %392 = vmatpush3.msra.mxu0 %v179_v9 }
   0xe   :  { %393 = vmatprep.subr.mxu0 %v178_v11  ;;  %450 = vmatpush3.msra.mxu1 %v178_v11 }
   0xf   :  { %394 = vmatpush3.msra.mxu0 %v178_v11  ;;  %435 = vmatprep.subr.mxu1 %v177_v13 }
  0x10   :  { %382 = vmatmul.mubr.msk.f32.gmra.mxu0 %vm28_vm0, %v22_v12  ;;  %395 = vmatprep.subr.mxu0 %v177_v13 }
  0x11   :  { %384 = vmatprep.mubr.msk.f32.mxu0 %vm28_vm0, %v23_v14  ;;  %396 = vmatpush3.msra.mxu0 %v177_v13 }
  0x12   :  { %397 = vmatprep.subr.mxu0 %v176_v15  ;;  %451 = vmatpush3.msra.mxu1 %v177_v13 }
  0x13   :  { %398 = vmatpush3.msra.mxu0 %v176_v15  ;;  %436 = vmatprep.subr.mxu1 %v176_v15 }
  0x14   :  { %385 = vmatmul.mubr.msk.f32.gmra.mxu0 %vm28_vm0, %v24_v16  ;;  %399 = vmatprep.subr.mxu0 %v175_v17 }
  0x15   :  { %400 = vmatpush3.msra.mxu0 %v175_v17  ;;  %452 = vmatpush3.msra.mxu1 %v176_v15 }
  0x16   :  { %401 = vmatprep.subr.mxu0 %v174_v18  ;;  %437 = vmatprep.subr.mxu1 %v175_v17 }
  0x17   :  { %402 = vmatpush3.msra.mxu0 %v174_v18  ;;  %453 = vmatpush3.msra.mxu1 %v175_v17 }
  0x18   :  { %403 = vmatprep.subr.mxu0 %v173_v19  ;;  %438 = vmatprep.subr.mxu1 %v174_v18 }
  0x19   :  { %404 = vmatpush3.msra.mxu0 %v173_v19  ;;  %454 = vmatpush3.msra.mxu1 %v174_v18 }
  0x1a   :  { %405 = vmatprep.subr.mxu0 %v172_v20  ;;  %439 = vmatprep.subr.mxu1 %v173_v19 }
  0x1b   :  { %406 = vmatpush3.msra.mxu0 %v172_v20  ;;  %455 = vmatpush3.msra.mxu1 %v173_v19 }
  0x1c   :  { %407 = vmatprep.subr.mxu0 %v171_v21  ;;  %440 = vmatprep.subr.mxu1 %v172_v20 }
  0x1d   :  { %408 = vmatpush3.msra.mxu0 %v171_v21  ;;  %456 = vmatpush3.msra.mxu1 %v172_v20 }
  0x1e   :  { %409 = vmatprep.subr.mxu0 %v170_v22  ;;  %441 = vmatprep.subr.mxu1 %v171_v21 }
  0x1f   :  { %410 = vmatpush3.msra.mxu0 %v170_v22  ;;  %457 = vmatpush3.msra.mxu1 %v171_v21 }
  0x20   :  { %411 = vmatprep.subr.mxu0 %v169_v23  ;;  %442 = vmatprep.subr.mxu1 %v170_v22 }
  0x21   :  { %412 = vmatpush3.msra.mxu0 %v169_v23  ;;  %458 = vmatpush3.msra.mxu1 %v170_v22 }
  0x22   :  { %443 = vmatprep.subr.mxu1 %v169_v23  ;;  %413 = vmatprep.subr.mxu0 %v168_v24 }
  0x23   :  { %459 = vmatpush3.msra.mxu1 %v169_v23  ;;  %414 = vmatpush3.msra.mxu0 %v168_v24 }
  0x24   :  { %444 = vmatprep.subr.mxu1 %v168_v24  ;;  %415 = vmatprep.subr.mxu0 %v167_v25 }
  0x25   :  { %460 = vmatpush3.msra.mxu1 %v168_v24  ;;  %416 = vmatpush3.msra.mxu0 %v167_v25 }
  0x26   :  { %445 = vmatprep.subr.mxu1 %v167_v25  ;;  %417 = vmatprep.subr.mxu0 %v166_v26 }
  0x27   :  { %461 = vmatpush3.msra.mxu1 %v167_v25  ;;  %418 = vmatpush3.msra.mxu0 %v166_v26 }
  0x28   :  { %446 = vmatprep.subr.mxu1 %v166_v26 }
  0x29   :  { %462 = vmatpush3.msra.mxu1 %v166_v26 }
  0xc8   :  { %v377_v27 = vpop.f32.mrf.mxu0 }
  0xc9   :  { %v159_v30 = vmax.f32 %v377_v27, 0.0 }
  0xca   :  { %v119_v28 = vpop.f32.mrf.mxu0 }
  0xcb   :  { %v158_v29 = vmax.f32 %v119_v28, 0.0 }
  0xcc   :  { %v380_v31 = vpop.f32.mrf.mxu0 }
  0xcd   :  { %419 = vmatprep.mubr.f32.mxu0 %v158_v29  ;;  %v161_v34 = vmax.f32 %v380_v31, 0.0 }
  0xce   :  { %v129_v32 = vpop.f32.mrf.mxu0  ;;  %420 = vmatmul.mubr.f32.vlgmr.msra.gmra.mxu0 %v159_v30 }
  0xcf   :  { %v160_v33 = vmax.f32 %v129_v32, 0.0 }
  0xd0   :  { %v383_v35 = vpop.f32.mrf.mxu0 }
  0xd1   :  { %422 = vmatprep.mubr.f32.mxu1 %v160_v33  ;;  %v163_v38 = vmax.f32 %v383_v35, 0.0 }
  0xd2   :  { %v139_v36 = vpop.f32.mrf.mxu0  ;;  %423 = vmatmul.mubr.f32.vlgmr.msra.gmra.mxu1 %v161_v34 }
  0xd3   :  { %v162_v37 = vmax.f32 %v139_v36, 0.0 }
  0xd4   :  { %v386_v39 = vpop.f32.mrf.mxu0 }
  0xd5   :  { %425 = vmatprep.mubr.f32.mxu1 %v162_v37  ;;  %v165_v42 = vmax.f32 %v386_v39, 0.0 }
  0xd6   :  { %v149_v40 = vpop.f32.mrf.mxu0  ;;  %426 = vmatmul.mubr.f32.gmra.mxu1 %v163_v38 }
  0xd7   :  { %v164_v41 = vmax.f32 %v149_v40, 0.0 }
  0xd9   :  { %428 = vmatprep.mubr.f32.mxu1 %v164_v41 }
  0xda   :  { %429 = vmatmul.mubr.f32.gmra.mxu1 %v165_v42 }
 0x18e   :  { %v421_v44 = vpop.f32.mrf.mxu0 }
 0x18f   :  { %v261_v45 = vadd.f32 %v421_v44, %v333_v43 }
 0x190   :  { %v255_v46 = vpop.f32.mrf.mxu0 }
 0x191   :  { %463 = vtanh.f32 %v261_v45  ;;  %v256_v47 = vadd.f32 %v333_v43, %v255_v46 }
 0x192   :  { %v424_v48 = vpop.f32.mrf.mxu1 }
 0x193   :  { %465 = vtanh.f32 %v256_v47  ;;  %v271_v49 = vadd.f32 %v424_v48, %v333_v43 }
 0x194   :  { %v265_v51 = vpop.f32.mrf.mxu1 }
 0x195   :  { %467 = vtanh.f32 %v271_v49  ;;  %v266_v52 = vadd.f32 %v333_v43, %v265_v51 }
 0x196   :  { %v427_v53 = vpop.f32.mrf.mxu1 }
 0x197   :  { %469 = vtanh.f32 %v266_v52  ;;  %v281_v54 = vadd.f32 %v427_v53, %v333_v43 }
 0x198   :  { %v275_v56 = vpop.f32.mrf.mxu1 }
 0x199   :  { %471 = vtanh.f32 %v281_v54  ;;  %v276_v57 = vadd.f32 %v333_v43, %v275_v56 }
 0x19a   :  { %v430_v58 = vpop.f32.mrf.mxu1 }
 0x19b   :  { %473 = vtanh.f32 %v276_v57  ;;  %v291_v59 = vadd.f32 %v430_v58, %v333_v43 }
 0x19c   :  { %v285_v60 = vpop.f32.mrf.mxu1 }
 0x19d   :  { %475 = vtanh.f32 %v291_v59  ;;  %v286_v61 = vadd.f32 %v333_v43, %v285_v60 }
 0x19e   :  { %v464_v62 = vpop.eup %463 }
 0x19f   :  { %v306_v63 = vsel %vm296_vm1, %v261_v45, %v464_v62  ;;  %477 = vtanh.f32 %v286_v61 }
 0x1a0   :  { %v466_v0 = vpop.eup %465  ;;  %314 = vst [vmem:[%s632_s4 + $0x8] sm:$0xff] %v306_v63 }
 0x1a1   :  { %v305_v1 = vsel %vm296_vm1, %v256_v47, %v466_v0 }
 0x1a2   :  { %v468_v2 = vpop.eup %467  ;;  %313 = vst [vmem:[%s632_s4] sm:$0xff] %v305_v1 }
 0x1a3   :  { %v308_v3 = vsel %vm296_vm1, %v271_v49, %v468_v2 }
 0x1a4   :  { %v470_v4 = vpop.eup %469  ;;  %316 = vst [vmem:[%s632_s4 + $0x18] sm:$0xff] %v308_v3 }
 0x1a5   :  { %v307_v5 = vsel %vm296_vm1, %v266_v52, %v470_v4 }
 0x1a6   :  { %v472_v6 = vpop.eup %471  ;;  %315 = vst [vmem:[%s632_s4 + $0x10] sm:$0xff] %v307_v5 }
 0x1a7   :  { %v310_v7 = vsel %vm296_vm1, %v281_v54, %v472_v6 }
 0x1a8   :  { %v474_v8 = vpop.eup %473  ;;  %318 = vst [vmem:[%s632_s4 + $0x28] sm:$0xff] %v310_v7 }
 0x1a9   :  { %v309_v9 = vsel %vm296_vm1, %v276_v57, %v474_v8 }
 0x1aa   :  { %v476_v10 = vpop.eup %475  ;;  %317 = vst [vmem:[%s632_s4 + $0x20] sm:$0xff] %v309_v9 }
 0x1ab   :  { %v312_v11 = vsel %vm296_vm1, %v291_v59, %v476_v10 }
 0x1ac   :  { %v478_v12 = vpop.eup %477  ;;  %320 = vst [vmem:[%s632_s4 + $0x38] sm:$0xff] %v312_v11 }
 0x1ad   :  { %v311_v13 = vsel %vm296_vm1, %v286_v61, %v478_v12 }
 0x1ae   :  { %319 = vst [vmem:[%s632_s4 + $0x30] sm:$0xff] %v311_v13 }

</bundles_post_ra>
